<compile_context>
chip_gen: v6e
topology: v6e:2x2x1
jax: 0.10.0
libtpu: 0.0.40
codegen_flags: <defaults>
</compile_context>

<pallas_src>
import jax
import jax.numpy as jnp
from jax.experimental import pallas as pl
from jax.experimental.pallas import tpu as pltpu

LANE = 128
SUBLANE = 8
_MIB = 1 << 20


def _round_up(x, m):
    return ((x + m - 1) // m) * m


# ---------------------------------------------------------------------------
# In-kernel helpers
# ---------------------------------------------------------------------------
def _linear(x, w_ref, b_ref):
    """y = x @ W + b with MXU-native (bf16) inputs and f32 accumulation."""
    w = w_ref[...]
    y = jnp.dot(x.astype(w.dtype), w, preferred_element_type=jnp.float32)
    return y + b_ref[...]                       # bias is (1, d) f32, broadcasts


def _gated_text(txt, aw1_ref, ab1_ref, aw2_ref, ab2_ref):
    """txt * softmax(Linear(ReLU(Linear(txt))), dim=1).  Padded lanes carry a
    -1e9 bias on the second linear, so they vanish after exp()."""
    h = jnp.maximum(_linear(txt, aw1_ref, ab1_ref), 0.0)
    s = _linear(h, aw2_ref, ab2_ref)
    s = s - jnp.max(s, axis=1, keepdims=True)
    e = jnp.exp(s)
    inv = pl.reciprocal(jnp.sum(e, axis=1, keepdims=True), approx=True)
    return txt * (e * inv)


def _scale_shift(t, wss_ref, bss_ref, d):
    """Fused scale/shift projection: one (rows, d) @ (d, 2d) matmul, then split."""
    ss = _linear(t, wss_ref, bss_ref)           # (rows, 2d)
    return jnp.tanh(ss[:, :d]), ss[:, d:]       # split at a lane-tile boundary


def _fused_pair_kernel(img_ref, txt_ref,
                       aw1_ref, ab1_ref, aw2_ref, ab2_ref,
                       wss_ref, bss_ref, w1_ref, b1_ref, w2_ref, b2_ref,
                       out_ref):
    """cell_id in {0, 3}: gate(text) then refine(image, gated_text)."""
    img = img_ref[...]
    d = img.shape[-1]
    t = _gated_text(txt_ref[...], aw1_ref, ab1_ref, aw2_ref, ab2_ref)
    scaling, shifting = _scale_shift(t, wss_ref, bss_ref, d)
    x = img * scaling + shifting
    h = jnp.maximum(_linear(x, w1_ref, b1_ref), 0.0)
    out_ref[...] = (_linear(h, w2_ref, b2_ref) + img).astype(out_ref.dtype)


def _fused_cross_kernel(img_ref, txt_ref,
                        aw1_ref, ab1_ref, aw2_ref, ab2_ref,
                        wss_ref, bss_ref, w1_ref, b1_ref, w2_ref, b2_ref,
                        out_ref):
    """Cross branch: txt_ref holds a block of `tt` text rows; refine the whole
    image batch against each of them.  The MLP runs once on (tt*bs, d)."""
    img = img_ref[...]                                          # (bs, d) f32
    bs, d = img.shape
    t = _gated_text(txt_ref[...], aw1_ref, ab1_ref, aw2_ref, ab2_ref)   # (tt, d)
    scaling, shifting = _scale_shift(t, wss_ref, bss_ref, d)            # (tt, d)
    tt = scaling.shape[0]
    # X[i, b] = img[b] * scaling[i] + shifting[i]
    x = (img[None, :, :] * scaling[:, None, :]
         + shifting[:, None, :]).reshape(tt * bs, d)
    h = jnp.maximum(_linear(x, w1_ref, b1_ref), 0.0)                    # (tt*bs, d)
    modu = _linear(h, w2_ref, b2_ref)                                   # (tt*bs, d)
    # Residual added in (tt, bs, d) shape: no materialised broadcast buffer.
    res = (modu.reshape(tt, bs, d) + img[None, :, :]).reshape(tt * bs, d)
    out_ref[...] = res.astype(out_ref.dtype)


# ---------------------------------------------------------------------------
# VMEM / cost bookkeeping
# ---------------------------------------------------------------------------
def _weight_bytes(d, w_itemsize):
    # aw1, aw2, w1, w2: (d,d); wss: (d,2d)  -> 6*d*d weight elems; 6 bias rows
    return 6 * d * d * w_itemsize + 6 * d * 4


def _vmem_bytes_cross(bs, d, tt, w_itemsize):
    # gridded path: every operand (incl. constant-index weights) is still
    # double-buffered by the BlockSpec pipeline -> count it at 2x.
    resident = 2 * (_weight_bytes(d, w_itemsize)
                    + bs * d * 4 + tt * d * 4 + tt * bs * d * 4)
    intermediates = 5 * tt * bs * d * 4 + 6 * tt * d * 4
    return resident + intermediates


def _vmem_bytes_pair(bs, d, w_itemsize):
    return _weight_bytes(d, w_itemsize) + 3 * bs * d * 4 + 8 * bs * d * 4


def _vmem_limit_bytes(estimate):
    # headroom for compiler temporaries, clamped so it stays sane on v7x (64 MiB)
    return int(min(max(2 * estimate, 32 * _MIB), 64 * _MIB))


def _cost_estimate(bs, d, mlp_rows, w_itemsize):
    matmul_rows = 4 * bs + 2 * mlp_rows      # gate(2) + scale/shift(~2) + MLP(2)
    flops = 2 * matmul_rows * d * d
    transcendentals = 3 * bs * d             # exp + tanh (+ reciprocals)
    bytes_accessed = (2 * bs * d * 4
                      + _weight_bytes(d, w_itemsize)
                      + mlp_rows * d * 4)
    return pl.CostEstimate(flops=int(flops),
                           transcendentals=int(transcendentals),
                           bytes_accessed=int(bytes_accessed))


# ---------------------------------------------------------------------------
# pallas_call wrappers
# ---------------------------------------------------------------------------
def refine_pair_fused(img, txt, params):
    bs, d = img.shape
    w_isz = params[0].dtype.itemsize
    vmem = pl.BlockSpec(memory_space=pltpu.MemorySpace.VMEM)
    return pl.pallas_call(
        _fused_pair_kernel,
        out_shape=jax.ShapeDtypeStruct((bs, d), jnp.float32),
        in_specs=[vmem] * (2 + len(params)),
        out_specs=vmem,
        compiler_params=pltpu.CompilerParams(
            vmem_limit_bytes=_vmem_limit_bytes(_vmem_bytes_pair(bs, d, w_isz))),
        cost_estimate=_cost_estimate(bs, d, bs, w_isz),
    )(img, txt, *params)


def _pick_text_block(bs, d, w_itemsize, budget_bytes=40 * _MIB):
    """Pick a sublane-aligned text-block size tt (divisor of bs) such that the
    VMEM estimate fits the budget, preferring >=4 grid steps (>=2 per v7x TC)."""
    cands = [t for t in range(SUBLANE, bs, SUBLANE) if bs % t == 0]
    if not cands:
        return bs                                     # no aligned proper divisor
    fitting = [t for t in cands
               if _vmem_bytes_cross(bs, d, t, w_itemsize) <= budget_bytes]
    deep = [t for t in fitting if bs // t >= 4]
    if deep:
        return max(deep)
    if fitting:
        return max(fitting)
    return min(cands)                                 # nothing fits: smallest block


def refine_cross_fused(img, txt, params, text_block=None, out_dtype=jnp.float32):
    bs, d = img.shape
    w_isz = params[0].dtype.itemsize
    tt = text_block if text_block is not None else _pick_text_block(bs, d, w_isz)
    assert bs % tt == 0
    n_blk = bs // tt
    cost = _cost_estimate(bs, d, bs * bs, w_isz)
    limit = _vmem_limit_bytes(_vmem_bytes_cross(bs, d, tt, w_isz))
    out_shape = jax.ShapeDtypeStruct((bs * bs, d), out_dtype)

    if n_blk == 1:
        # Single invocation, whole arrays resident in VMEM (no degenerate grid).
        vmem = pl.BlockSpec(memory_space=pltpu.MemorySpace.VMEM)
        out = pl.pallas_call(
            _fused_cross_kernel,
            out_shape=out_shape,
            in_specs=[vmem] * (2 + len(params)),
            out_specs=vmem,
            compiler_params=pltpu.CompilerParams(vmem_limit_bytes=limit),
            cost_estimate=cost,
        )(img, txt, *params)
    else:
        def const_spec(shape):
            n = len(shape)
            return pl.BlockSpec(shape, lambda i, _n=n: (0,) * _n)

        in_specs = [const_spec((bs, d)),                       # full image batch
                    pl.BlockSpec((tt, d), lambda i: (i, 0))]   # text-row block
        in_specs += [const_spec(p.shape) for p in params]      # resident weights
        out = pl.pallas_call(
            _fused_cross_kernel,
            out_shape=out_shape,
            grid=(n_blk,),
            in_specs=in_specs,
            out_specs=pl.BlockSpec((tt * bs, d), lambda i: (i, 0)),
            compiler_params=pltpu.CompilerParams(
                dimension_semantics=("parallel",),
                vmem_limit_bytes=limit),
            cost_estimate=cost,
        )(img, txt, *params)
    return out.reshape(bs, bs, d)


# ---------------------------------------------------------------------------
# Module (deterministic synthetic parameters) with lane padding
# ---------------------------------------------------------------------------
def _init_linear(key, fan_in, fan_out):
    kw, kb = jax.random.split(key)
    bound = 1.0 / (fan_in ** 0.5)
    w = jax.random.uniform(kw, (fan_in, fan_out), jnp.float32, -bound, bound)
    b = jax.random.uniform(kb, (1, fan_out), jnp.float32, -bound, bound)
    return w, b


class CrossModalRefinementCellPallas:
    def __init__(self, embed_dim, batch_size, key, mxu_dtype=jnp.bfloat16,
                 cross_out_dtype=jnp.float32):
        self.embed_dim = embed_dim
        self.d_pad = max(_round_up(embed_dim, LANE), LANE)
        self.bs = batch_size
        self.mxu_dtype = mxu_dtype
        self.cross_out_dtype = cross_out_dtype
        d = embed_dim
        keys = jax.random.split(key, 8)
        # self.attention: Linear -> ReLU -> Linear -> Softmax(dim=1)   (logical f32 params)
        self.attn_w1, self.attn_b1 = _init_linear(keys[0], d, d)
        self.attn_w2, self.attn_b2 = _init_linear(keys[1], d, d)
        # self.attention1 exists in __init__ but is unused in forward (mirrors reference).
        self.attn1_w1, self.attn1_b1 = _init_linear(keys[2], d, d)
        self.attn1_w2, self.attn1_b2 = _init_linear(keys[3], d, d)
        # TODO(synk): `Refinement` class body was not provided in the reference snippet;
        # implemented the standard DIME gated refinement (tanh scale / shift modulation
        # + 2-layer ReLU MLP + residual), i.e. 4 Linear(d, d) layers.
        self.ref_wsc, self.ref_bsc = _init_linear(keys[4], d, d)
        self.ref_wsh, self.ref_bsh = _init_linear(keys[5], d, d)
        self.ref_w1, self.ref_b1 = _init_linear(keys[6], d, d)
        self.ref_w2, self.ref_b2 = _init_linear(keys[7], d, d)
        self._build_kernel_params()

    def _build_kernel_params(self):
        d, dp = self.embed_dim, self.d_pad

        def pad_w(w):   # zero-pad to (dp, dp), cast to MXU dtype
            return (jnp.zeros((dp, dp), jnp.float32).at[:d, :d].set(w)
                    .astype(self.mxu_dtype))

        def pad_b(b, fill=0.0):   # biases stay f32
            return jnp.full((1, dp), fill, jnp.float32).at[:, :d].set(b)

        aw1, ab1 = pad_w(self.attn_w1), pad_b(self.attn_b1)
        # -1e9 bias on padded softmax logits -> exp underflows to 0, denominator
        # only sums the real lanes.
        aw2, ab2 = pad_w(self.attn_w2), pad_b(self.attn_b2, fill=-1e9)
        # Fused scale/shift: one (dp, 2*dp) matmul instead of two skinny ones.
        wss = jnp.concatenate([pad_w(self.ref_wsc), pad_w(self.ref_wsh)], axis=1)
        bss = jnp.concatenate([pad_b(self.ref_bsc), pad_b(self.ref_bsh)], axis=1)
        w1, b1 = pad_w(self.ref_w1), pad_b(self.ref_b1)
        w2, b2 = pad_w(self.ref_w2), pad_b(self.ref_b2)
        self.kernel_params = (aw1, ab1, aw2, ab2, wss, bss, w1, b1, w2, b2)

    def _pad_inp(self, x):
        d, dp = self.embed_dim, self.d_pad
        x = x.astype(jnp.float32)
        if dp == d:
            return x
        return jnp.pad(x, ((0, 0), (0, dp - d)))

    def __call__(self, image_features, text_features, cell_id):
        img = self._pad_inp(image_features)
        txt = self._pad_inp(text_features)
        d = self.embed_dim
        if cell_id != 0 and cell_id != 3:
            out = refine_cross_fused(img, txt, self.kernel_params,
                                     out_dtype=self.cross_out_dtype)
            return out[:, :, :d]
        out = refine_pair_fused(img, txt, self.kernel_params)
        return out[:, :d]


# ---------------------------------------------------------------------------
# Pure-JAX reference (f32, logical dims) for correctness sanity check
# ---------------------------------------------------------------------------
def _ref_forward(cell, img, txt, cell_id):
    def lin(x, w, b):
        return x @ w + b

    h = jax.nn.relu(lin(txt, cell.attn_w1, cell.attn_b1))
    attn = jax.nn.softmax(lin(h, cell.attn_w2, cell.attn_b2), axis=1)
    t = txt * attn

    def refine(im, tx):
        x = (im * jnp.tanh(lin(tx, cell.ref_wsc, cell.ref_bsc))
             + lin(tx, cell.ref_wsh, cell.ref_bsh))
        return lin(jax.nn.relu(lin(x, cell.ref_w1, cell.ref_b1)),
                   cell.ref_w2, cell.ref_b2) + im

    if cell_id != 0 and cell_id != 3:
        return jnp.stack([refine(img, jnp.broadcast_to(t[i], img.shape))
                          for i in range(img.shape[0])], axis=0)
    return refine(img, t)


if __name__ == "__main__":
    key = jax.random.PRNGKey(0)
    k1, k2, k3, k4, k5, k6 = jax.random.split(key, 6)

    # --- small case: bs=8, d=32 -> exercises lane padding (kernel runs at 128
    #     lanes) and the single-shot fused pair / cross paths --------------------
    bs, d = 8, 32
    image_features = jax.random.normal(k1, (bs, d), jnp.float32)
    text_features = jax.random.normal(k2, (bs, d), jnp.float32)
    cell = CrossModalRefinementCellPallas(embed_dim=d, batch_size=bs, key=k3)

    out_pair = jax.block_until_ready(cell(image_features, text_features, cell_id=0))
    out_cross = jax.block_until_ready(cell(image_features, text_features, cell_id=1))
    assert out_pair.shape == (bs, d)
    assert out_cross.shape == (bs, bs, d)

    ref_pair = _ref_forward(cell, image_features, text_features, 0)
    ref_cross = _ref_forward(cell, image_features, text_features, 1)
    # bf16 MXU inputs + approx reciprocal -> loose-but-meaningful tolerance.
    assert jnp.allclose(out_pair, ref_pair, atol=5e-2, rtol=5e-2)
    assert jnp.allclose(out_cross, ref_cross, atol=5e-2, rtol=5e-2)

    # --- lane-dense case: bs=16, d=128 -> gridded ("parallel") cross path with
    #     two text blocks of 8 rows -------------------------------------------
    bs2, d2 = 16, 128
    image_features2 = jax.random.normal(k4, (bs2, d2), jnp.float32)
    text_features2 = jax.random.normal(k5, (bs2, d2), jnp.float32)
    cell2 = CrossModalRefinementCellPallas(embed_dim=d2, batch_size=bs2, key=k6)
    out_cross2 = jax.block_until_ready(cell2(image_features2, text_features2, cell_id=2))
    ref_cross2 = _ref_forward(cell2, image_features2, text_features2, 2)
    assert out_cross2.shape == (bs2, bs2, d2)
    assert jnp.allclose(out_cross2, ref_cross2, atol=5e-2, rtol=5e-2)

    print("KERNEL_OK")
</pallas_src>

<mosaic_0001>
module attributes {stable_mosaic.version = 11 : i64} {
  func.func @_fused_pair_kernel(%arg0: memref<8x128xf32, #tpu.memory_space<vmem>>, %arg1: memref<8x128xf32, #tpu.memory_space<vmem>>, %arg2: memref<128x128xbf16, #tpu.memory_space<vmem>>, %arg3: memref<1x128xf32, #tpu.memory_space<vmem>>, %arg4: memref<128x128xbf16, #tpu.memory_space<vmem>>, %arg5: memref<1x128xf32, #tpu.memory_space<vmem>>, %arg6: memref<128x256xbf16, #tpu.memory_space<vmem>>, %arg7: memref<1x256xf32, #tpu.memory_space<vmem>>, %arg8: memref<128x128xbf16, #tpu.memory_space<vmem>>, %arg9: memref<1x128xf32, #tpu.memory_space<vmem>>, %arg10: memref<128x128xbf16, #tpu.memory_space<vmem>>, %arg11: memref<1x128xf32, #tpu.memory_space<vmem>>, %arg12: memref<8x128xf32, #tpu.memory_space<vmem>>) attributes {dimension_semantics = [], scalar_prefetch = 0 : i64, scratch_operands = 0 : i64, tpu.core_type = #tpu.core_type<tc>} {
    %c0 = arith.constant 0 : index
    %c0_0 = arith.constant 0 : index
    %0 = vector.load %arg0[%c0, %c0_0] : memref<8x128xf32, #tpu.memory_space<vmem>>, vector<8x128xf32>
    %c0_1 = arith.constant 0 : index
    %c0_2 = arith.constant 0 : index
    %1 = vector.load %arg1[%c0_1, %c0_2] : memref<8x128xf32, #tpu.memory_space<vmem>>, vector<8x128xf32>
    %c0_3 = arith.constant 0 : index
    %c0_4 = arith.constant 0 : index
    %2 = vector.load %arg2[%c0_3, %c0_4] : memref<128x128xbf16, #tpu.memory_space<vmem>>, vector<128x128xbf16>
    %3 = arith.truncf %1 : vector<8x128xf32> to vector<8x128xbf16>
    %cst = arith.constant dense<0.000000e+00> : vector<8x128xf32>
    %4 = tpu.matmul %3, %2, %cst {dimension_numbers = #tpu.dot_dimension_numbers<[1], [0], [0], [1], [0, 0, 1, 1], [], []>} : vector<8x128xbf16>, vector<128x128xbf16>, vector<8x128xf32> -> vector<8x128xf32>
    %c0_5 = arith.constant 0 : index
    %c0_6 = arith.constant 0 : index
    %5 = vector.load %arg3[%c0_5, %c0_6] : memref<1x128xf32, #tpu.memory_space<vmem>>, vector<1x128xf32>
    %6 = vector.broadcast %5 : vector<1x128xf32> to vector<8x128xf32>
    %7 = arith.addf %4, %6 : vector<8x128xf32>
    %cst_7 = arith.constant 0.000000e+00 : f32
    %8 = vector.broadcast %cst_7 : f32 to vector<8x128xf32>
    %9 = arith.maximumf %7, %8 : vector<8x128xf32>
    %c0_8 = arith.constant 0 : index
    %c0_9 = arith.constant 0 : index
    %10 = vector.load %arg4[%c0_8, %c0_9] : memref<128x128xbf16, #tpu.memory_space<vmem>>, vector<128x128xbf16>
    %11 = arith.truncf %9 : vector<8x128xf32> to vector<8x128xbf16>
    %cst_10 = arith.constant dense<0.000000e+00> : vector<8x128xf32>
    %12 = tpu.matmul %11, %10, %cst_10 {dimension_numbers = #tpu.dot_dimension_numbers<[1], [0], [0], [1], [0, 0, 1, 1], [], []>} : vector<8x128xbf16>, vector<128x128xbf16>, vector<8x128xf32> -> vector<8x128xf32>
    %c0_11 = arith.constant 0 : index
    %c0_12 = arith.constant 0 : index
    %13 = vector.load %arg5[%c0_11, %c0_12] : memref<1x128xf32, #tpu.memory_space<vmem>>, vector<1x128xf32>
    %14 = vector.broadcast %13 : vector<1x128xf32> to vector<8x128xf32>
    %15 = arith.addf %12, %14 : vector<8x128xf32>
    %cst_13 = arith.constant dense<0xFF800000> : vector<8xf32>
    %16 = vector.multi_reduction <maximumf>, %15, %cst_13 [1] : vector<8x128xf32> to vector<8xf32>
    %17 = vector.shape_cast %16 : vector<8xf32> to vector<8x1xf32>
    %18 = vector.broadcast %17 : vector<8x1xf32> to vector<8x128xf32>
    %19 = arith.subf %15, %18 : vector<8x128xf32>
    %20 = math.exp %19 : vector<8x128xf32>
    %cst_14 = arith.constant dense<0.000000e+00> : vector<8xf32>
    %21 = vector.multi_reduction <add>, %20, %cst_14 [1] : vector<8x128xf32> to vector<8xf32>
    %22 = vector.shape_cast %21 : vector<8xf32> to vector<8x1xf32>
    %23 = tpu.reciprocal %22 {approx = true} : vector<8x1xf32> -> vector<8x1xf32>
    %24 = vector.broadcast %23 : vector<8x1xf32> to vector<8x128xf32>
    %25 = arith.mulf %20, %24 : vector<8x128xf32>
    %26 = arith.mulf %1, %25 : vector<8x128xf32>
    %c0_15 = arith.constant 0 : index
    %c0_16 = arith.constant 0 : index
    %27 = vector.load %arg6[%c0_15, %c0_16] : memref<128x256xbf16, #tpu.memory_space<vmem>>, vector<128x256xbf16>
    %28 = arith.truncf %26 : vector<8x128xf32> to vector<8x128xbf16>
    %cst_17 = arith.constant dense<0.000000e+00> : vector<8x256xf32>
    %29 = tpu.matmul %28, %27, %cst_17 {dimension_numbers = #tpu.dot_dimension_numbers<[1], [0], [0], [1], [0, 0, 1, 1], [], []>} : vector<8x128xbf16>, vector<128x256xbf16>, vector<8x256xf32> -> vector<8x256xf32>
    %c0_18 = arith.constant 0 : index
    %c0_19 = arith.constant 0 : index
    %30 = vector.load %arg7[%c0_18, %c0_19] : memref<1x256xf32, #tpu.memory_space<vmem>>, vector<1x256xf32>
    %31 = vector.broadcast %30 : vector<1x256xf32> to vector<8x256xf32>
    %32 = arith.addf %29, %31 : vector<8x256xf32>
    %33 = vector.extract_strided_slice %32 {offsets = [0, 0], sizes = [8, 128], strides = [1, 1]} : vector<8x256xf32> to vector<8x128xf32>
    %34 = math.tanh %33 : vector<8x128xf32>
    %35 = vector.extract_strided_slice %32 {offsets = [0, 128], sizes = [8, 128], strides = [1, 1]} : vector<8x256xf32> to vector<8x128xf32>
    %36 = arith.mulf %0, %34 : vector<8x128xf32>
    %37 = arith.addf %36, %35 : vector<8x128xf32>
    %c0_20 = arith.constant 0 : index
    %c0_21 = arith.constant 0 : index
    %38 = vector.load %arg8[%c0_20, %c0_21] : memref<128x128xbf16, #tpu.memory_space<vmem>>, vector<128x128xbf16>
    %39 = arith.truncf %37 : vector<8x128xf32> to vector<8x128xbf16>
    %cst_22 = arith.constant dense<0.000000e+00> : vector<8x128xf32>
    %40 = tpu.matmul %39, %38, %cst_22 {dimension_numbers = #tpu.dot_dimension_numbers<[1], [0], [0], [1], [0, 0, 1, 1], [], []>} : vector<8x128xbf16>, vector<128x128xbf16>, vector<8x128xf32> -> vector<8x128xf32>
    %c0_23 = arith.constant 0 : index
    %c0_24 = arith.constant 0 : index
    %41 = vector.load %arg9[%c0_23, %c0_24] : memref<1x128xf32, #tpu.memory_space<vmem>>, vector<1x128xf32>
    %42 = vector.broadcast %41 : vector<1x128xf32> to vector<8x128xf32>
    %43 = arith.addf %40, %42 : vector<8x128xf32>
    %cst_25 = arith.constant 0.000000e+00 : f32
    %44 = vector.broadcast %cst_25 : f32 to vector<8x128xf32>
    %45 = arith.maximumf %43, %44 : vector<8x128xf32>
    %c0_26 = arith.constant 0 : index
    %c0_27 = arith.constant 0 : index
    %46 = vector.load %arg10[%c0_26, %c0_27] : memref<128x128xbf16, #tpu.memory_space<vmem>>, vector<128x128xbf16>
    %47 = arith.truncf %45 : vector<8x128xf32> to vector<8x128xbf16>
    %cst_28 = arith.constant dense<0.000000e+00> : vector<8x128xf32>
    %48 = tpu.matmul %47, %46, %cst_28 {dimension_numbers = #tpu.dot_dimension_numbers<[1], [0], [0], [1], [0, 0, 1, 1], [], []>} : vector<8x128xbf16>, vector<128x128xbf16>, vector<8x128xf32> -> vector<8x128xf32>
    %c0_29 = arith.constant 0 : index
    %c0_30 = arith.constant 0 : index
    %49 = vector.load %arg11[%c0_29, %c0_30] : memref<1x128xf32, #tpu.memory_space<vmem>>, vector<1x128xf32>
    %50 = vector.broadcast %49 : vector<1x128xf32> to vector<8x128xf32>
    %51 = arith.addf %48, %50 : vector<8x128xf32>
    %52 = arith.addf %51, %0 : vector<8x128xf32>
    %c0_31 = arith.constant 0 : index
    %c0_32 = arith.constant 0 : index
    %53 = vector.load %arg12[%c0_31, %c0_32] : memref<8x128xf32, #tpu.memory_space<vmem>>, vector<8x128xf32>
    tpu.vector_store %arg12[%c0_31, %c0_32], %52 {strides = array<i32>} : memref<8x128xf32, #tpu.memory_space<vmem>>, vector<8x128xf32>,
    return
  }
}

</mosaic_0001>

<bundles_post_ra>
// kernel: tpu_custom_call.1
= control target key start
LH: loop header
LB: loop body
LE: loop exit
PB: predicated region body
PF: predicated region fallthrough
CT: control target
= control target key end

     0   :  { %17 = vsyncpa [#allocation3], 0  ;;  %s1360_s0 = inlined_call_operand.hbm [shape: f32[8,128], index: 0, kind: input, shape index: {}]   ;;  %s1361_s1 = inlined_call_operand.hbm [shape: f32[8,128], index: 1, kind: input, shape index: {}]   ;;  %s1362_s2 = inlined_call_operand.hbm [shape: bf16[128,128], index: 2, kind: input, shape index: {}]   ;;  %s1363_s3 = inlined_call_operand.vmem [shape: f32[1,128], index: 3, kind: input, shape index: {}]   ;;  %s1364_s4 = inlined_call_operand.hbm [shape: bf16[128,128], index: 4, kind: input, shape index: {}]   ;;  %s1365_s5 = inlined_call_operand.vmem [shape: f32[1,128], index: 5, kind: input, shape index: {}]   ;;  %s1366_s6 = inlined_call_operand.hbm [shape: bf16[128,256], index: 6, kind: input, shape index: {}]   ;;  %s1367_s7 = inlined_call_operand.vmem [shape: f32[1,256], index: 7, kind: input, shape index: {}]   ;;  %s1368_s8 = inlined_call_operand.hbm [shape: bf16[128,128], index: 8, kind: input, shape index: {}]   ;;  %s1369_s9 = inlined_call_operand.vmem [shape: f32[1,128], index: 9, kind: input, shape index: {}]   ;;  %s1370_s10 = inlined_call_operand.hbm [shape: bf16[128,128], index: 10, kind: input, shape index: {}]   ;;  %s1371_s11 = inlined_call_operand.vmem [shape: f32[1,128], index: 11, kind: input, shape index: {}]   ;;  %s1372_s12 = inlined_call_operand.hbm [shape: f32[8,128], index: 12, kind: output, shape index: {}]  }
   0x1   :  { %18 = vsyncpa [#allocation6], 0 }
   0x2   :  { %19 = vsyncpa [#allocation9], 0 }
   0x3   :  { %20 = vsyncpa [#allocation12], 0 }
   0x4   :  { %21 = vsyncpa [#allocation4], 0  ;;  %s1184_s21 = smov [#allocation5]  }
   0x5   :  { %s38_s22 = sshll.u32 %s1184_s21, 4  ;;  %s39_s22 = int_to_ptr.vmem [resolvable:$true] %s38_s22 }
   0x6   :  { %s1022_s23 = scalar_lea.vmem %s39_s22, 128  ;;  %p1027_p1 = scmp.lt.s32.totalorder %s39_s22, %s39_s22 }
   0x7   :  { %p1023_p0 = scmp.ne.s32.totalorder %s39_s22, %s1022_s23  ;;  %p1028_p2 = scmp.lt.s32.totalorder %s1022_s23, %s1022_s23 }
   0x9   :  { %p1029_p3 = por %p1028_p2, %p1027_p1 }
   0xb   :  { %p1030_p4 = pnand %p1029_p3, %p1023_p0 }
   0xd   :  { %1033 = shalt.err (!%p1030_p4)
}
   0xe   :  { %41 = dma.hbm_to_vmem [thread:$0]  %s1361_s1, 128, %s39_s22, [#allocation6]  }
   0xf   :  { %s1185_s26 = smov [#allocation8]   ;;  %s1186_s28 = smov [#allocation11]  }
  0x10   :  { %s61_s27 = sshll.u32 %s1185_s26, 4  ;;  %s89_s29 = sshll.u32 %s1186_s28, 4  ;;  %s62_s27 = int_to_ptr.vmem [resolvable:$true] %s61_s27  ;;  %s90_s29 = int_to_ptr.vmem [resolvable:$true] %s89_s29 }
  0x11   :  { %s1042_s30 = scalar_lea.vmem %s62_s27, 1024  ;;  %p1047_p6 = scmp.lt.s32.totalorder %s62_s27, %s62_s27 }
  0x12   :  { %p1043_p5 = scmp.ne.s32.totalorder %s62_s27, %s1042_s30  ;;  %p1048_p7 = scmp.lt.s32.totalorder %s1042_s30, %s1042_s30 }
  0x14   :  { %p1049_p8 = por %p1048_p7, %p1047_p6 }
  0x16   :  { %p1050_p9 = pnand %p1049_p8, %p1043_p5 }
  0x18   :  { %1053 = shalt.err (!%p1050_p9)
}
  0x19   :  { %s1187_s13 = smov 64   ;;  %s1188_s14 = smov 4  }
  0x1a   :  { %67 = dma.hbm_to_vmem [thread:$0]  %s1364_s4, 1024, %s62_s27, [#allocation9], %s1187_s13, %s1187_s13, %s1188_s14  }
  0x1b   :  { %s1062_s1 = scalar_lea.vmem %s90_s29, 1024  ;;  %p1067_p11 = scmp.lt.s32.totalorder %s90_s29, %s90_s29 }
  0x1c   :  { %p1063_p10 = scmp.ne.s32.totalorder %s90_s29, %s1062_s1  ;;  %p1068_p12 = scmp.lt.s32.totalorder %s1062_s1, %s1062_s1 }
  0x1e   :  { %p1069_p13 = por %p1068_p12, %p1067_p11 }
  0x20   :  { %p1070_p0 = pnand %p1069_p13, %p1063_p10 }
  0x22   :  { %1073 = shalt.err (!%p1070_p0)
}
  0x23   :  { %95 = dma.hbm_to_vmem [thread:$0]  %s1368_s8, 1024, %s90_s29, [#allocation12], %s1187_s13, %s1187_s13, %s1188_s14  }
  0x24   :  { %s1189_s19 = smov [#allocation2]   ;;  %s1190_s21 = smov [#allocation7]  }
  0x25   :  { %s28_s20 = sshll.u32 %s1189_s19, 4  ;;  %s47_s4 = sshll.u32 %s1190_s21, 4  ;;  %s29_s20 = int_to_ptr.vmem [resolvable:$true] %s28_s20  ;;  %s48_s4 = int_to_ptr.vmem [resolvable:$true] %s47_s4 }
  0x26   :  { %s1082_s22 = scalar_lea.vmem %s29_s20, 128  ;;  %p1087_p2 = scmp.lt.s32.totalorder %s29_s20, %s29_s20 }
  0x27   :  { %p1083_p1 = scmp.ne.s32.totalorder %s29_s20, %s1082_s22  ;;  %p1088_p3 = scmp.lt.s32.totalorder %s1082_s22, %s1082_s22 }
  0x29   :  { %p1089_p4 = por %p1088_p3, %p1087_p2 }
  0x2b   :  { %p1090_p5 = pnand %p1089_p4, %p1083_p1 }
  0x2d   :  { %1093 = shalt.err (!%p1090_p5)
}
  0x2e   :  { %31 = dma.hbm_to_vmem [thread:$0]  %s1360_s0, 128, %s29_s20, [#allocation3]  }
  0x2f   :  { %s1102_s25 = scalar_lea.vmem %s48_s4, 1024  ;;  %p1107_p7 = scmp.lt.s32.totalorder %s48_s4, %s48_s4 }
  0x30   :  { %p1103_p6 = scmp.ne.s32.totalorder %s48_s4, %s1102_s25  ;;  %p1108_p8 = scmp.lt.s32.totalorder %s1102_s25, %s1102_s25 }
  0x32   :  { %p1109_p9 = por %p1108_p8, %p1107_p7 }
  0x34   :  { %p1110_p10 = pnand %p1109_p9, %p1103_p6 }
  0x36   :  { %1113 = shalt.err (!%p1110_p10)
}
  0x37   :  { %53 = dma.hbm_to_vmem [thread:$0]  %s1362_s2, 1024, %s48_s4, [#allocation6], %s1187_s13, %s1187_s13, %s1188_s14  }
  0x38   :  { %s1191_s27 = smov [#allocation10]  }
  0x39   :  { %s75_s28 = sshll.u32 %s1191_s27, 4  ;;  %s76_s28 = int_to_ptr.vmem [resolvable:$true] %s75_s28 }
  0x3a   :  { %s1122_s29 = scalar_lea.vmem %s76_s28, 2048  ;;  %p1127_p12 = scmp.lt.s32.totalorder %s76_s28, %s76_s28 }
  0x3b   :  { %p1123_p11 = scmp.ne.s32.totalorder %s76_s28, %s1122_s29  ;;  %p1128_p13 = scmp.lt.s32.totalorder %s1122_s29, %s1122_s29 }
  0x3d   :  { %p1129_p0 = por %p1128_p13, %p1127_p12 }
  0x3f   :  { %p1130_p1 = pnand %p1129_p0, %p1123_p11 }
  0x41   :  { %1133 = shalt.err (!%p1130_p1)
}
  0x42   :  { %s1192_s0 = smov 128   ;;  %s1193_s30 = smov 8  }
  0x43   :  { %81 = dma.hbm_to_vmem [thread:$0]  %s1366_s6, 2048, %s76_s28, [#allocation9], %s1192_s0, %s1192_s0, %s1193_s30  }
  0x44   :  { %s1194_s1 = smov [#allocation13]  }
  0x45   :  { %s103_s17 = sshll.u32 %s1194_s1, 4  ;;  %s104_s17 = int_to_ptr.vmem [resolvable:$true] %s103_s17 }
  0x46   :  { %s1142_s2 = scalar_lea.vmem %s104_s17, 1024  ;;  %p1147_p3 = scmp.lt.s32.totalorder %s104_s17, %s104_s17 }
  0x47   :  { %p1143_p2 = scmp.ne.s32.totalorder %s104_s17, %s1142_s2  ;;  %p1148_p4 = scmp.lt.s32.totalorder %s1142_s2, %s1142_s2 }
  0x49   :  { %p1149_p5 = por %p1148_p4, %p1147_p3 }
  0x4b   :  { %p1150_p6 = pnand %p1149_p5, %p1143_p2 }
  0x4d   :  { %1153 = shalt.err (!%p1150_p6)
}
  0x4e   :  { %109 = dma.hbm_to_vmem [thread:$0]  %s1370_s10, 1024, %s104_s17, [#allocation12], %s1187_s13, %s1187_s13, %s1188_s14  }
  0x4f   :  { %1174 = dma.done.wait [#allocation3], 128  }
  0x50   :  { %1175 = vsyncadd [#allocation3], 4294967168 }
  0x51   :  { %1176 = dma.done.wait [#allocation6], 1152  }
  0x52   :  { %1177 = vsyncadd [#allocation6], 4294966144 }
  0x53   :  { %1178 = dma.done.wait [#allocation9], 3072  }
  0x54   :  { %1179 = vsyncadd [#allocation9], 4294964224 }
  0x55   :  { %1180 = dma.done.wait [#allocation12], 2048  }
  0x56   :  { %1181 = vsyncadd [#allocation12], 4294965248  ;;  %v1195_v0 = vmov 0.0   ;;  %vm1196_vm0 = vmmov 0   ;;  %v952_v1 = vld [vmem:[#allocation7 + $0x38] sm:$0xff]   ;;  %v953_v2 = vld [vmem:[#allocation7 + $0x30] sm:$0xff]  }
  0x57   :  { %857 = vmatprep.subr.bf16.mxu0 %v1195_v0  ;;  %873 = vmatprep.mubr.msk.bf16.mxu0 %vm1196_vm0, %v1195_v0  ;;  %v954_v3 = vld [vmem:[#allocation7 + $0x28] sm:$0xff]   ;;  %v960_v4 = vld [vmem:[#allocation8 + $0x38] sm:$0xff]   ;;  %v955_v5 = vld [vmem:[#allocation7 + $0x20] sm:$0xff]   ;;  %v1197_v48 = vmov 0   ;;  %s1198_s22 = smov [#allocation14]  }
  0x58   :  { %877 = vmatprep.subr.bf16.mxu1 %v1195_v0  ;;  %893 = vmatprep.mubr.msk.bf16.mxu1 %vm1196_vm0, %v1195_v0  ;;  %v961_v6 = vld [vmem:[#allocation8 + $0x30] sm:$0xff]   ;;  %v956_v7 = vld [vmem:[#allocation7 + $0x18] sm:$0xff]   ;;  %v962_v8 = vld [vmem:[#allocation8 + $0x28] sm:$0xff]   ;;  %s757_s23 = sshll.u32 %s1198_s22, 4  ;;  %s758_s23 = int_to_ptr.vmem [resolvable:$true] %s757_s23 }
  0x59   :  { %858 = vmatpush3.bf16.msra.mxu0 %v952_v1  ;;  %878 = vmatpush3.bf16.msra.mxu1 %v960_v4  ;;  %v957_v9 = vld [vmem:[#allocation7 + $0x10] sm:$0xff]   ;;  %v963_v10 = vld [vmem:[#allocation8 + $0x20] sm:$0xff]   ;;  %v958_v11 = vld [vmem:[#allocation7 + $0x8] sm:$0xff]   ;;  %p1159_p8 = scmp.lt.s32.totalorder %s758_s23, %s758_s23 }
  0x5a   :  { %859 = vmatprep.subr.bf16.mxu0 %v1195_v0  ;;  %879 = vmatprep.subr.bf16.mxu1 %v1195_v0  ;;  %v964_v12 = vld [vmem:[#allocation8 + $0x18] sm:$0xff]   ;;  %v959_v13 = vld [vmem:[#allocation7] sm:$0xff]   ;;  %v965_v15 = vld [vmem:[#allocation8 + $0x10] sm:$0xff]  }
  0x5b   :  { %v1312_v14 = vld [vmem:[#allocation5] sm:$0xff]  ;;  %v966_v17 = vld [vmem:[#allocation8 + $0x8] sm:$0xff]   ;;  %v967_v18 = vld [vmem:[#allocation8] sm:$0xff]  }
  0x5c   :  { %v152_v16 = vpack.c.bf16 %v1312_v14, %v1312_v14  ;;  %v769_v19 = vld [vmem:[%s1363_s3] ss:$0 sm:$0xff]  ;;  %v970_v34 = vld [vmem:[#allocation10 + $0x74] ss:$8 sps:$4 sm:$0xff]   ;;  %v973_v35 = vld [vmem:[#allocation10 + $0x64] ss:$8 sps:$4 sm:$0xff]  }
  0x5d   :  { %860 = vmatpush3.bf16.msra.mxu0 %v953_v2  ;;  %880 = vmatpush3.bf16.msra.mxu1 %v961_v6  ;;  %v778_v27 = vld [vmem:[%s1365_s5] ss:$0 sm:$0xff]  ;;  %v971_v36 = vld [vmem:[#allocation10 + $0x60] ss:$8 sps:$4 sm:$0xff]   ;;  %v976_v37 = vld [vmem:[#allocation10 + $0x54] ss:$8 sps:$4 sm:$0xff]  }
  0x5e   :  { %861 = vmatprep.subr.bf16.mxu0 %v1195_v0  ;;  %881 = vmatprep.subr.bf16.mxu1 %v1195_v0  ;;  %v968_v33 = vld [vmem:[#allocation10 + $0x70] ss:$8 sps:$4 sm:$0xff]   ;;  %v979_v43 = vld [vmem:[#allocation10 + $0x44] ss:$8 sps:$4 sm:$0xff]   ;;  %v977_v44 = vld [vmem:[#allocation10 + $0x40] ss:$8 sps:$4 sm:$0xff]  }
  0x5f   :  { %v974_v38 = vld [vmem:[#allocation10 + $0x50] ss:$8 sps:$4 sm:$0xff]   ;;  %v982_v45 = vld [vmem:[#allocation10 + $0x34] ss:$8 sps:$4 sm:$0xff]   ;;  %v985_v47 = vld [vmem:[#allocation10 + $0x24] ss:$8 sps:$4 sm:$0xff]  }
  0x60   :  { %v980_v46 = vld [vmem:[#allocation10 + $0x30] ss:$8 sps:$4 sm:$0xff]   ;;  %v983_v49 = vld [vmem:[#allocation10 + $0x20] ss:$8 sps:$4 sm:$0xff]   ;;  %v988_v50 = vld [vmem:[#allocation10 + $0x14] ss:$8 sps:$4 sm:$0xff]  }
  0x61   :  { %862 = vmatpush3.bf16.msra.mxu0 %v954_v3  ;;  %882 = vmatpush3.bf16.msra.mxu1 %v962_v8  ;;  %v986_v51 = vld [vmem:[#allocation10 + $0x10] ss:$8 sps:$4 sm:$0xff]   ;;  %v991_v52 = vld [vmem:[#allocation10 + $0x4] ss:$8 sps:$4 sm:$0xff]   ;;  %v989_v53 = vld [vmem:[#allocation10] ss:$8 sps:$4 sm:$0xff]  }
  0x62   :  { %863 = vmatprep.subr.bf16.mxu0 %v1195_v0  ;;  %883 = vmatprep.subr.bf16.mxu1 %v1195_v0  ;;  %v992_v54 = vld [vmem:[#allocation11 + $0x38] sm:$0xff]   ;;  %v993_v55 = vld [vmem:[#allocation11 + $0x30] sm:$0xff]   ;;  %v994_v61 = vld [vmem:[#allocation11 + $0x28] sm:$0xff]  }
  0x63   :  { %v995_v62 = vld [vmem:[#allocation11 + $0x20] sm:$0xff]   ;;  %v996_v63 = vld [vmem:[#allocation11 + $0x18] sm:$0xff]   ;;  %v997_v1 = vld [vmem:[#allocation11 + $0x10] sm:$0xff]  }
  0x64   :  { %v998_v2 = vld [vmem:[#allocation11 + $0x8] sm:$0xff]   ;;  %v999_v3 = vld [vmem:[#allocation11] sm:$0xff]   ;;  %v1000_v4 = vld [vmem:[#allocation13 + $0x38] sm:$0xff]  }
  0x65   :  { %864 = vmatpush3.bf16.msra.mxu0 %v955_v5  ;;  %884 = vmatpush3.bf16.msra.mxu1 %v963_v10  ;;  %v1001_v5 = vld [vmem:[#allocation13 + $0x30] sm:$0xff]   ;;  %v1002_v6 = vld [vmem:[#allocation13 + $0x28] sm:$0xff]   ;;  %v1004_v8 = vld [vmem:[#allocation13 + $0x18] sm:$0xff]   ;;  %v390_v10 = vlaneseq }
  0x66   :  { %865 = vmatprep.subr.bf16.mxu0 %v1195_v0  ;;  %885 = vmatprep.subr.bf16.mxu1 %v1195_v0 }
  0x69   :  { %866 = vmatpush3.bf16.msra.mxu0 %v956_v7  ;;  %886 = vmatpush3.bf16.msra.mxu1 %v964_v12  ;;  %v1003_v7 = vld [vmem:[#allocation13 + $0x20] sm:$0xff]  }
  0x6a   :  { %867 = vmatprep.subr.bf16.mxu0 %v1195_v0  ;;  %887 = vmatprep.subr.bf16.mxu1 %v1195_v0 }
  0x6d   :  { %868 = vmatpush3.bf16.msra.mxu0 %v957_v9  ;;  %888 = vmatpush3.bf16.msra.mxu1 %v965_v15  ;;  %v1005_v9 = vld [vmem:[#allocation13 + $0x10] sm:$0xff]  }
  0x6e   :  { %869 = vmatprep.subr.bf16.mxu0 %v1195_v0  ;;  %889 = vmatprep.subr.bf16.mxu1 %v1195_v0 }
  0x71   :  { %870 = vmatpush3.bf16.msra.mxu0 %v958_v11  ;;  %890 = vmatpush3.bf16.msra.mxu1 %v966_v17  ;;  %v391_v11 = vshrl.u32 %v390_v10, 7 }
  0x72   :  { %871 = vmatprep.subr.bf16.mxu0 %v1195_v0  ;;  %891 = vmatprep.subr.bf16.mxu1 %v1195_v0 }
  0x73   :  { %v392_v12 = vsub.s32 0, %v391_v11 }
  0x75   :  { %872 = vmatpush3.bf16.msra.mxu0 %v959_v13  ;;  %892 = vmatpush3.bf16.msra.mxu1 %v967_v18  ;;  %v388_v13 = vld [vmem:[%s1367_s7] sm:$0x3] }
  0x76   :  { %897 = vmatprep.subr.bf16.mxu1 %v1195_v0  ;;  %480 = vmatprep.subr.bf16.mxu0 %v970_v34 }
  0x78   :  { %874 = vmatmul.mubr.bf16.vlgmr.msra.gmra.mxu0 %v152_v16 }
  0x79   :  { %481 = vmatpush1.bf16.msra.mxu0 %v968_v33  ;;  %512 = vmatprep.mubr.bf16.mxu0 %v1197_v48 }
  0x7a   :  { %482 = vmatprep.subr.bf16.mxu0 %v973_v35 }
  0x7d   :  { %483 = vmatpush1.bf16.msra.mxu0 %v971_v36 }
  0x7e   :  { %484 = vmatprep.subr.bf16.mxu0 %v976_v37 }
  0x81   :  { %485 = vmatpush1.bf16.msra.mxu0 %v974_v38  ;;  %v812_v38 = vld [vmem:[%s1371_s11] ss:$0 sm:$0xff] }
  0x82   :  { %486 = vmatprep.subr.bf16.mxu0 %v979_v43 }
  0x85   :  { %487 = vmatpush1.bf16.msra.mxu0 %v977_v44 }
  0x86   :  { %488 = vmatprep.subr.bf16.mxu0 %v982_v45 }
  0x89   :  { %489 = vmatpush1.bf16.msra.mxu0 %v980_v46 }
  0x8a   :  { %490 = vmatprep.subr.bf16.mxu0 %v985_v47 }
  0x8d   :  { %491 = vmatpush1.bf16.msra.mxu0 %v983_v49 }
  0x8e   :  { %492 = vmatprep.subr.bf16.mxu0 %v988_v50 }
  0x91   :  { %493 = vmatpush1.bf16.msra.mxu0 %v986_v51 }
  0x92   :  { %494 = vmatprep.subr.bf16.mxu0 %v991_v52 }
  0x95   :  { %495 = vmatpush1.bf16.msra.mxu0 %v989_v53 }
  0x96   :  { %917 = vmatprep.subr.bf16.mxu0 %v1195_v0 }
 0x138   :  { %v242_v20 = vpop.f32.mrf.mxu0 }
 0x139   :  { %v243_v21 = vadd.f32 %v769_v19, %v242_v20  ;;  %v396_v20 = vsub.s32 1, %v391_v11 }
 0x13a   :  { %v875_v22 = vpop.f32.mrf.mxu0 }
 0x13b   :  { %v248_v23 = vmax.f32 %v243_v21, 0.0  ;;  %v397_v21 = vrot.slane %v388_v13, %v396_v20  ;;  %v134_v22 = vld [vmem:[#allocation2] sm:$0xff] }
 0x13c   :  { %v245_v24 = vpop.f32.mrf.mxu0 }
 0x13d   :  { %v265_v25 = vpack.c.bf16 %v248_v23, %v248_v23 }
 0x13e   :  { %v876_v26 = vpop.f32.mrf.mxu0 }
 0x13f   :  { %894 = vmatmul.mubr.bf16.vlgmr.msra.gmra.mxu1 %v265_v25 }
 0x140   :  { %913 = vmatprep.mubr.msk.bf16.mxu1 %vm1196_vm0, %v1195_v0  ;;  %898 = vmatpush3.bf16.msra.mxu1 %v992_v54 }
 0x141   :  { %899 = vmatprep.subr.bf16.mxu1 %v1195_v0 }
 0x144   :  { %900 = vmatpush3.bf16.msra.mxu1 %v993_v55 }
 0x145   :  { %901 = vmatprep.subr.bf16.mxu1 %v1195_v0 }
 0x148   :  { %902 = vmatpush3.bf16.msra.mxu1 %v994_v61 }
 0x149   :  { %903 = vmatprep.subr.bf16.mxu1 %v1195_v0 }
 0x14c   :  { %904 = vmatpush3.bf16.msra.mxu1 %v995_v62 }
 0x14d   :  { %905 = vmatprep.subr.bf16.mxu1 %v1195_v0 }
 0x150   :  { %906 = vmatpush3.bf16.msra.mxu1 %v996_v63 }
 0x151   :  { %907 = vmatprep.subr.bf16.mxu1 %v1195_v0 }
 0x154   :  { %908 = vmatpush3.bf16.msra.mxu1 %v997_v1 }
 0x155   :  { %909 = vmatprep.subr.bf16.mxu1 %v1195_v0 }
 0x158   :  { %910 = vmatpush3.bf16.msra.mxu1 %v998_v2 }
 0x159   :  { %911 = vmatprep.subr.bf16.mxu1 %v1195_v0 }
 0x15c   :  { %912 = vmatpush3.bf16.msra.mxu1 %v999_v3 }
 0x1ff   :  { %v355_v28 = vpop.f32.mrf.mxu1 }
 0x200   :  { %v356_v29 = vadd.f32 %v778_v27, %v355_v28  ;;  %v1006_v28 = vld [vmem:[#allocation13 + $0x8] sm:$0xff]  }
 0x201   :  { %v895_v30 = vpop.f32.mrf.mxu1 }
 0x202   :  { %361 = vmax.xlane.f32.xlu0 %v356_v29  ;;  %v803_v30 = vld [vmem:[%s1369_s9] ss:$0 sm:$0xff]  ;;  %s1154_s9 = scalar_lea.vmem %s758_s23, 128 }
 0x203   :  { %v358_v31 = vpop.f32.mrf.mxu1  ;;  %p1155_p7 = scmp.ne.s32.totalorder %s758_s23, %s1154_s9  ;;  %p1160_p9 = scmp.lt.s32.totalorder %s1154_s9, %s1154_s9 }
 0x205   :  { %v896_v32 = vpop.f32.mrf.mxu1  ;;  %p1161_p10 = por %p1160_p9, %p1159_p8 }
 0x207   :  { %p1162_p11 = pnand %p1161_p10, %p1155_p7 }
 0x28b   :  { %v362_v39 = vpop.xlane.xlu0 %361 }
 0x28c   :  { %v363_v40 = vsub.f32 %v356_v29, %v362_v39  ;;  %v1007_v29 = vld [vmem:[#allocation13] sm:$0xff]  }
 0x28e   :  { %v364_v41 = vmul.f32 1.442695, %v363_v40 }
 0x290   :  { %1008 = vpow2.f32 %v364_v41 }
 0x29d   :  { %v1009_v42 = vpop.eup %1008 }
 0x29e   :  { %366 = vadd.xlane.f32.xlu0 %v1009_v42 }
 0x327   :  { %v367_v56 = vpop.xlane.xlu0 %366 }
 0x328   :  { %1010 = vrcp.f32 %v367_v56 }
 0x335   :  { %v1011_v57 = vpop.eup %1010 }
 0x336   :  { %v369_v58 = vmul.f32 %v1011_v57, %v1009_v42 }
 0x338   :  { %v370_v59 = vmul.f32 %v369_v58, %v1312_v14  ;;  %v393_v14 = vrot.slane %v388_v13, %v392_v12 }
 0x33a   :  { %v387_v60 = vpack.c.bf16 %v370_v59, %v370_v59 }
 0x33c   :  { %513 = vmatmul.mubr.bf16.vlgmr.msra.gmra.mxu0 %v387_v60 }
 0x33d   :  { %933 = vmatprep.mubr.msk.bf16.mxu0 %vm1196_vm0, %v1195_v0  ;;  %918 = vmatpush3.bf16.msra.mxu0 %v1000_v4 }
 0x33e   :  { %919 = vmatprep.subr.bf16.mxu0 %v1195_v0 }
 0x341   :  { %920 = vmatpush3.bf16.msra.mxu0 %v1001_v5 }
 0x342   :  { %921 = vmatprep.subr.bf16.mxu0 %v1195_v0 }
 0x345   :  { %922 = vmatpush3.bf16.msra.mxu0 %v1002_v6 }
 0x346   :  { %923 = vmatprep.subr.bf16.mxu0 %v1195_v0 }
 0x349   :  { %924 = vmatpush3.bf16.msra.mxu0 %v1003_v7 }
 0x34a   :  { %925 = vmatprep.subr.bf16.mxu0 %v1195_v0 }
 0x34d   :  { %926 = vmatpush3.bf16.msra.mxu0 %v1004_v8 }
 0x34e   :  { %927 = vmatprep.subr.bf16.mxu0 %v1195_v0 }
 0x351   :  { %928 = vmatpush3.bf16.msra.mxu0 %v1005_v9 }
 0x352   :  { %929 = vmatprep.subr.bf16.mxu0 %v1195_v0 }
 0x355   :  { %930 = vmatpush3.bf16.msra.mxu0 %v1006_v28 }
 0x356   :  { %931 = vmatprep.subr.bf16.mxu0 %v1195_v0 }
 0x359   :  { %932 = vmatpush3.bf16.msra.mxu0 %v1007_v29 }
 0x3fc   :  { %v514_v15 = vpop.f32.mrf.mxu0 }
 0x3fd   :  { %v515_v16 = vadd.f32 %v514_v15, %v393_v14 }
 0x3fe   :  { %v516_v17 = vpop.f32.mrf.mxu0 }
 0x3ff   :  { %1012 = vtanh.f32 %v515_v16  ;;  %v517_v24 = vadd.f32 %v516_v17, %v397_v21 }
 0x400   :  { %v518_v18 = vpop.f32.mrf.mxu0 }
 0x402   :  { %v519_v19 = vpop.f32.mrf.mxu0 }
 0x40c   :  { %v1013_v23 = vpop.eup %1012 }
 0x40d   :  { %v522_v25 = vmul.f32 %v1013_v23, %v134_v22 }
 0x40f   :  { %v523_v26 = vadd.f32 %v522_v25, %v517_v24 }
 0x411   :  { %v540_v27 = vpack.c.bf16 %v523_v26, %v523_v26 }
 0x413   :  { %914 = vmatmul.mubr.bf16.vlgmr.msra.gmra.mxu1 %v540_v27 }
 0x4d3   :  { %v630_v31 = vpop.f32.mrf.mxu1 }
 0x4d4   :  { %v631_v32 = vadd.f32 %v803_v30, %v630_v31 }
 0x4d5   :  { %v915_v33 = vpop.f32.mrf.mxu1 }
 0x4d6   :  { %v636_v34 = vmax.f32 %v631_v32, 0.0 }
 0x4d7   :  { %v633_v35 = vpop.f32.mrf.mxu1 }
 0x4d8   :  { %v653_v36 = vpack.c.bf16 %v636_v34, %v636_v34 }
 0x4d9   :  { %v916_v37 = vpop.f32.mrf.mxu1 }
 0x4da   :  { %934 = vmatmul.mubr.bf16.vlgmr.msra.gmra.mxu0 %v653_v36 }
 0x59a   :  { %v743_v39 = vpop.f32.mrf.mxu0 }
 0x59b   :  { %v744_v0 = vadd.f32 %v812_v38, %v743_v39 }
 0x59c   :  { %v935_v40 = vpop.f32.mrf.mxu0 }
 0x59d   :  { %v749_v41 = vadd.f32 %v744_v0, %v134_v22 }
 0x59e   :  { %v746_v42 = vpop.f32.mrf.mxu0 }
 0x59f   :  { %750 = vst [vmem:[#allocation14] sm:$0xff] %v749_v41 }
 0x5a0   :  { %v936_v43 = vpop.f32.mrf.mxu0 }
 0x5a1   :  { %1165 = shalt.err (!%p1162_p11)
}
 0x5a2   :  { %760 = dma.vmem_to_hbm [thread:$0]  %s758_s23, 128, %s1372_s12, [#allocation4]  }
 0x5a3   :  { %1182 = dma.done.wait [#allocation4], 128  }
 0x5a4   :  { %1183 = vsyncadd [#allocation4], 4294967168 }
 0x5a5   :  { %764 = vsyncpa [#allocation3], 1 }
 0x5a6   :  { %765 = vsyncpa [#allocation6], 1 }
 0x5a7   :  { %766 = vsyncpa [#allocation9], 1 }
 0x5a8   :  { %767 = vsyncpa [#allocation12], 1 }
 0x5a9   :  { %768 = vsyncpa [#allocation4], 1 }

</bundles_post_ra>
